<compile_context>
chip_gen: v7x
topology: tpu7x:2x2x1
jax: 0.10.0
libtpu: 0.0.40
codegen_flags: <defaults>
</compile_context>

<pallas_src>
import functools

import jax
import jax.numpy as jnp
from jax import lax
from jax.experimental import pallas as pl
from jax.experimental.pallas import tpu as pltpu


# ---------------------------------------------------------------------------
# Pallas kernel: softmax_rgb_blend over the K faces of each pixel.
# ---------------------------------------------------------------------------
def _softmax_blend_kernel(frag_ref, colr_ref, colg_ref, colb_ref, out_ref, *,
                          inv_gamma, eps, bg, unroll):
    # frag_ref: (1, 2, K, TR, C)  [.,0] = logit = -dists/sigma (bg -> -1e30)
    #                             [.,1] = zinv  = (zfar-zbuf)/(zfar-znear) (bg -> 0)
    # col*_ref: (1, K, TR, C)     interpolated Gouraud color, one ref / channel
    # out_ref : (1, 4, TR, C)     RGBA
    k_dim = colr_ref.shape[1]
    tile = out_ref.shape[2:]                      # (TR, C)

    # ---- pass 1: zmax = clamp(max_k zinv, eps), streamed over K -------------
    def zstep(kk, zm):
        return jnp.maximum(zm, frag_ref[0, 1, kk])

    zmax = frag_ref[0, 1, 0]
    if k_dim <= 8:                                 # tiny K: full static unroll
        for kk in range(1, k_dim):
            zmax = zstep(kk, zmax)
    else:                                          # realistic K: bounded vregs
        zmax = lax.fori_loop(1, k_dim, zstep, zmax, unroll=unroll)
    zmax = jnp.maximum(zmax, eps)

    delta = jnp.maximum(jnp.exp((eps - zmax) * inv_gamma), eps)

    # ---- pass 2: streamed softmax accumulation over K -----------------------
    def step(kk, carry):
        keep, denom, r, g, b = carry
        # sigmoid(x) = 0.5*tanh(0.5*x) + 0.5 : one EUP op per element.
        prob = 0.5 * jnp.tanh(0.5 * frag_ref[0, 0, kk]) + 0.5
        keep = keep * (1.0 - prob)
        w = prob * jnp.exp((frag_ref[0, 1, kk] - zmax) * inv_gamma)
        denom = denom + w
        r = r + w * colr_ref[0, kk]
        g = g + w * colg_ref[0, kk]
        b = b + w * colb_ref[0, kk]
        return keep, denom, r, g, b

    init = (jnp.ones(tile, jnp.float32), delta,
            jnp.zeros(tile, jnp.float32), jnp.zeros(tile, jnp.float32),
            jnp.zeros(tile, jnp.float32))
    if k_dim <= 8:
        carry = init
        for kk in range(k_dim):
            carry = step(kk, carry)
    else:
        carry = lax.fori_loop(0, k_dim, step, init, unroll=unroll)
    keep, denom, r, g, b = carry

    # Approx reciprocal (EUP) + two Newton steps (VPU) -> ~f32-accurate 1/denom.
    inv_d = pl.reciprocal(denom, approx=True)
    inv_d = inv_d * (2.0 - denom * inv_d)
    inv_d = inv_d * (2.0 - denom * inv_d)

    wbg = delta * inv_d
    out_ref[0, 0] = r * inv_d + wbg * bg[0]
    out_ref[0, 1] = g * inv_d + wbg * bg[1]
    out_ref[0, 2] = b * inv_d + wbg * bg[2]
    out_ref[0, 3] = 1.0 - keep


# ---------------------------------------------------------------------------
# Tiling heuristics (generation-aware).
# ---------------------------------------------------------------------------
_TEMP_ROWS = 12      # live (TR, C) f32 temporaries inside the kernel body


def _vmem_capacity_bytes():
    try:
        return int(pltpu.get_tpu_info().vmem_capacity_bytes)
    except Exception:
        return 64 * 1024 * 1024          # conservative default (v7x per-TC VMEM)


def _bytes_per_pixel(k):
    # double-buffered blocks (frag 2K + colors 3K + out 4) + kernel temps, f32
    return 4 * (2 * (5 * k + 4) + _TEMP_ROWS)


def _spatial_layout(s, k, budget_bytes):
    """Return (rows, lanes, padded_pixels): lane-dense lanes, rows % 8 == 0."""
    per_px = _bytes_per_pixel(k)
    for c in (1024, 512, 256, 128):
        if s % (8 * c) == 0 and 8 * c * per_px <= budget_bytes:
            return s // c, c, s
    # Odd / small sizes: pad the flattened pixel axis to a multiple of 1024 so
    # C = 128 (lane-dense stores) and R is a multiple of 8 (tileable rows).
    s_pad = -(-s // 1024) * 1024
    return s_pad // 128, 128, s_pad


def _choose_tile_rows(r, k, c, budget_bytes, min_tiles=8):
    """Largest 8-aligned row tile fitting the VMEM budget, capped so the row
    grid keeps >= min_tiles tiles (pipelining + v7x 2-TC sharding)."""
    per_row = c * _bytes_per_pixel(k)
    vmem_tr = max(8, (budget_bytes // per_row) // 8 * 8)
    pipe_tr = max(8, (-(-r // min_tiles)) // 8 * 8)
    return max(8, min(vmem_tr, pipe_tr, r))


# ---------------------------------------------------------------------------
# Wrapper around the Pallas blend kernel.
# ---------------------------------------------------------------------------
def _softmax_rgb_blend_pallas(col_rgb, pix_to_face, dists, zbuf, *,
                              sigma, gamma, background_color, znear, zfar):
    # col_rgb: list of 3 arrays (N, K, H*W), one per channel, pixel-minor.
    n, h, w, k = pix_to_face.shape
    s = h * w
    eps = 1e-10

    vmem_cap = _vmem_capacity_bytes()
    budget = vmem_cap // 4
    r, c, s_pad = _spatial_layout(s, k, budget)
    tr = _choose_tile_rows(r, k, c, budget)

    # Fuse mask + scale into one relayout: a single stacked (N,2,K,R,C) f32
    # fragment stream; pix_to_face (int32) never reaches the kernel.
    mask = pix_to_face >= 0
    logit = jnp.where(mask,
                      dists.astype(jnp.float32) * (-1.0 / float(sigma)),
                      jnp.float32(-1e30))
    zinv = jnp.where(mask,
                     (zfar - zbuf.astype(jnp.float32)) / (zfar - znear),
                     jnp.float32(0.0))
    frag = jnp.stack([logit, zinv], axis=1)                   # (N, 2, H, W, K)
    frag = jnp.transpose(frag, (0, 1, 4, 2, 3)).reshape(n, 2, k, s)

    pad = s_pad - s
    if pad:
        frag = jnp.pad(frag, ((0, 0), (0, 0), (0, 0), (0, pad)))
        col_rgb = [jnp.pad(cc, ((0, 0), (0, 0), (0, pad))) for cc in col_rgb]
    frag = frag.reshape(n, 2, k, r, c)
    col_rgb = [cc.reshape(n, k, r, c) for cc in col_rgb]

    block_bytes = 4 * tr * c * (5 * k + 4)
    temps_bytes = 4 * tr * c * _TEMP_ROWS
    vmem_limit = int(min((3 * vmem_cap) // 4,                  # 48 MiB on v7x
                         max(32 << 20,
                             2 * block_bytes + temps_bytes + (4 << 20))))

    kernel = functools.partial(
        _softmax_blend_kernel,
        inv_gamma=float(1.0 / gamma),
        eps=float(eps),
        bg=tuple(float(x) for x in background_color),
        unroll=4)

    col_spec = pl.BlockSpec((1, k, tr, c), lambda i, t: (i, 0, t, 0))
    out = pl.pallas_call(
        kernel,
        out_shape=jax.ShapeDtypeStruct((n, 4, r, c), jnp.float32),
        grid=(n, pl.cdiv(r, tr)),
        in_specs=[
            pl.BlockSpec((1, 2, k, tr, c), lambda i, t: (i, 0, 0, t, 0)),
            col_spec, col_spec, col_spec,
        ],
        out_specs=pl.BlockSpec((1, 4, tr, c), lambda i, t: (i, 0, t, 0)),
        compiler_params=pltpu.CompilerParams(
            dimension_semantics=("parallel", "parallel"),
            vmem_limit_bytes=vmem_limit),
    )(frag, *col_rgb)

    out = out.reshape(n, 4, s_pad)
    if pad:
        out = out[:, :, :s]
    # pytorch3d returns (N, H, W, 4); this 4-channel relayout is the only
    # remaining post-kernel pass (drop it if the consumer accepts NCHW).
    return jnp.transpose(out.reshape(n, 4, h, w), (0, 2, 3, 1))


# ---------------------------------------------------------------------------
# Gouraud shading (pure JAX helpers, mirrors pytorch3d formulas).
# ---------------------------------------------------------------------------
def _normalize(v, eps=1e-6):
    return v / jnp.maximum(jnp.linalg.norm(v, axis=-1, keepdims=True), eps)


def _gouraud_vertex_colors(verts, verts_normals, verts_rgb, *,
                           camera_position, light_location, light_ambient,
                           light_diffuse, light_specular, mat_ambient,
                           mat_diffuse, mat_specular, shininess):
    """Per-vertex Phong lighting (pytorch3d PointLights + Materials)."""
    nrm = _normalize(verts_normals)
    direction = _normalize(jnp.asarray(light_location, jnp.float32) - verts)
    cos_angle = jnp.sum(nrm * direction, axis=-1)

    diffuse = (jnp.asarray(light_diffuse, jnp.float32)
               * jnp.maximum(cos_angle, 0.0)[..., None])

    view_dir = _normalize(jnp.asarray(camera_position, jnp.float32) - verts)
    reflect = -direction + 2.0 * cos_angle[..., None] * nrm
    spec_cos = (jnp.maximum(jnp.sum(view_dir * reflect, axis=-1), 0.0)
                * (cos_angle > 0.0))
    specular = (jnp.asarray(light_specular, jnp.float32)
                * (spec_cos ** shininess)[..., None])

    ambient = (jnp.asarray(mat_ambient, jnp.float32)
               * jnp.asarray(light_ambient, jnp.float32))
    diffuse = jnp.asarray(mat_diffuse, jnp.float32) * diffuse
    specular = jnp.asarray(mat_specular, jnp.float32) * specular

    return verts_rgb * (ambient + diffuse) + specular


def _interp_face_colors_klayout(pix_to_face, bary_coords, face_colors):
    """Barycentric interpolation of shaded face-vertex colors, produced
    directly in the blend kernel's pixel-minor layout: 3 x (N, K, H*W).

    pix_to_face / bary are transposed *before* the gather (cheap producers
    that XLA folds into the gather/interp fusion) so the large per-pixel
    colors are written exactly once, already in the kernel's layout."""
    n, h, w, k = pix_to_face.shape
    s = h * w
    p2f_t = jnp.transpose(pix_to_face, (0, 3, 1, 2)).reshape(n, k, s)
    bary_t = jnp.transpose(bary_coords, (0, 3, 4, 1, 2)).reshape(n, k, 3, s)
    idx = jnp.maximum(p2f_t, 0)
    bw = jnp.where((p2f_t >= 0)[:, :, None, :], bary_t, 0.0)     # (N,K,3,S)
    cols = []
    for ch in range(3):
        acc = bw[:, :, 0, :] * face_colors[:, 0, ch][idx]
        for v in (1, 2):
            acc = acc + bw[:, :, v, :] * face_colors[:, v, ch][idx]
        cols.append(acc)                                          # (N,K,S)
    return cols


def _interpolate_face_colors(pix_to_face, bary_coords, face_colors):
    """pytorch3d interpolate_face_attributes (reference path, NHWK3 layout)."""
    idx = jnp.maximum(pix_to_face, 0)
    gathered = face_colors[idx]                               # (N,H,W,K,3,3)
    colors = jnp.sum(bary_coords[..., :, None] * gathered, axis=-2)
    return jnp.where((pix_to_face >= 0)[..., None], colors, 0.0)


def soft_gouraud_shader(verts, verts_normals, verts_rgb, faces,
                        pix_to_face, bary_coords, zbuf, dists, *,
                        camera_position=(0.0, 0.0, 5.0),
                        light_location=(0.0, 1.0, 0.0),
                        light_ambient=(0.5, 0.5, 0.5),
                        light_diffuse=(0.3, 0.3, 0.3),
                        light_specular=(0.2, 0.2, 0.2),
                        mat_ambient=(1.0, 1.0, 1.0),
                        mat_diffuse=(1.0, 1.0, 1.0),
                        mat_specular=(1.0, 1.0, 1.0),
                        shininess=64.0,
                        sigma=1e-4, gamma=1e-4,
                        background_color=(1.0, 1.0, 1.0),
                        znear=1.0, zfar=100.0):
    """SoftGouraudShader.forward: Gouraud shading + softmax RGB blend."""
    # TODO(synk): per-vertex lighting, the face-index gather and barycentric
    # interpolation are data-dependent gathers over mesh topology and are left
    # to XLA; the memory-bound per-pixel softmax blend runs in Pallas.
    verts_shaded = _gouraud_vertex_colors(
        verts, verts_normals, verts_rgb,
        camera_position=camera_position, light_location=light_location,
        light_ambient=light_ambient, light_diffuse=light_diffuse,
        light_specular=light_specular, mat_ambient=mat_ambient,
        mat_diffuse=mat_diffuse, mat_specular=mat_specular,
        shininess=shininess)
    face_colors = verts_shaded[faces]                          # (F, 3, 3)
    col_rgb = _interp_face_colors_klayout(pix_to_face, bary_coords,
                                          face_colors)         # 3 x (N,K,S)
    return _softmax_rgb_blend_pallas(
        col_rgb, pix_to_face, dists, zbuf,
        sigma=sigma, gamma=gamma, background_color=background_color,
        znear=znear, zfar=zfar)


# ---------------------------------------------------------------------------
# Pure-JAX reference for the blend (textbook pytorch3d softmax_rgb_blend).
# ---------------------------------------------------------------------------
def _softmax_rgb_blend_ref(colors, pix_to_face, dists, zbuf, *,
                           sigma, gamma, background_color, znear, zfar):
    eps = 1e-10
    mask = (pix_to_face >= 0).astype(jnp.float32)
    prob_map = jax.nn.sigmoid(-dists / sigma) * mask
    alpha = jnp.prod(1.0 - prob_map, axis=-1)
    z_inv = (zfar - zbuf) / (zfar - znear) * mask
    z_inv_max = jnp.maximum(jnp.max(z_inv, axis=-1, keepdims=True), eps)
    weights_num = prob_map * jnp.exp((z_inv - z_inv_max) / gamma)
    delta = jnp.maximum(jnp.exp((eps - z_inv_max) / gamma), eps)
    denom = jnp.sum(weights_num, axis=-1, keepdims=True) + delta
    weighted_colors = jnp.sum(weights_num[..., None] * colors, axis=-2)
    weighted_background = delta * jnp.asarray(background_color, jnp.float32)
    rgb = (weighted_colors + weighted_background) / denom
    return jnp.concatenate([rgb, (1.0 - alpha)[..., None]], axis=-1)


def _reference_forward(verts, verts_normals, verts_rgb, faces,
                       pix_to_face, bary, zbuf, dists, shade_kw, blend_kw):
    verts_shaded = _gouraud_vertex_colors(verts, verts_normals, verts_rgb,
                                          **shade_kw)
    face_colors = verts_shaded[faces]
    pixel_colors = _interpolate_face_colors(pix_to_face, bary, face_colors)
    return _softmax_rgb_blend_ref(pixel_colors, pix_to_face, dists, zbuf,
                                  **blend_kw)


if __name__ == "__main__":
    shade_kw = dict(camera_position=(0.0, 0.0, 5.0),
                    light_location=(0.0, 1.0, 0.0),
                    light_ambient=(0.5, 0.5, 0.5),
                    light_diffuse=(0.3, 0.3, 0.3),
                    light_specular=(0.2, 0.2, 0.2),
                    mat_ambient=(1.0, 1.0, 1.0),
                    mat_diffuse=(1.0, 1.0, 1.0),
                    mat_specular=(1.0, 1.0, 1.0),
                    shininess=64.0)
    blend_kw = dict(sigma=1e-4, gamma=1e-4,
                    background_color=(1.0, 1.0, 1.0),
                    znear=1.0, zfar=100.0)

    fwd = jax.jit(functools.partial(soft_gouraud_shader, **shade_kw, **blend_kw))

    def run_case(seed, N, H, W, K, V, F):
        key = jax.random.PRNGKey(seed)
        keys = jax.random.split(key, 9)
        verts = jax.random.normal(keys[0], (V, 3), jnp.float32)
        verts_normals = _normalize(jax.random.normal(keys[1], (V, 3),
                                                     jnp.float32))
        verts_rgb = jax.random.uniform(keys[2], (V, 3), jnp.float32)
        faces = jax.random.randint(keys[3], (F, 3), 0, V, dtype=jnp.int32)
        pix_to_face = jnp.where(
            jax.random.uniform(keys[4], (N, H, W, K)) < 0.3,
            jnp.int32(-1),
            jax.random.randint(keys[5], (N, H, W, K), 0, F, dtype=jnp.int32))
        bary = jax.random.uniform(keys[6], (N, H, W, K, 3), jnp.float32,
                                  minval=1e-3, maxval=1.0)
        bary = bary / jnp.sum(bary, axis=-1, keepdims=True)
        zbuf = jax.random.uniform(keys[7], (N, H, W, K), jnp.float32,
                                  minval=1.0, maxval=50.0)
        dists = jax.random.normal(keys[8], (N, H, W, K), jnp.float32) * 1e-4

        out = jax.block_until_ready(
            fwd(verts, verts_normals, verts_rgb, faces,
                pix_to_face, bary, zbuf, dists))
        ref = _reference_forward(verts, verts_normals, verts_rgb, faces,
                                 pix_to_face, bary, zbuf, dists,
                                 shade_kw, blend_kw)
        assert out.shape == (N, H, W, 4), out.shape
        assert out.dtype == jnp.float32, out.dtype
        max_err = float(jnp.max(jnp.abs(out - ref)))
        assert jnp.allclose(out, ref, atol=1e-5, rtol=1e-5), max_err

    # Small-K case (statically unrolled kernel path).
    run_case(seed=0, N=2, H=16, W=16, K=4, V=12, F=20)
    # Larger-K case (fori_loop kernel path, padded spatial layout).
    run_case(seed=0, N=1, H=8, W=8, K=12, V=16, F=30)

    print("KERNEL_OK")
</pallas_src>

<mosaic_0001>
module attributes {stable_mosaic.version = 11 : i64} {
  func.func @_softmax_blend_kernel(%arg0: i32, %arg1: i32, %arg2: memref<1x2x4x8x128xf32, #tpu.memory_space<vmem>>, %arg3: memref<1x4x8x128xf32, #tpu.memory_space<vmem>>, %arg4: memref<1x4x8x128xf32, #tpu.memory_space<vmem>>, %arg5: memref<1x4x8x128xf32, #tpu.memory_space<vmem>>, %arg6: memref<1x4x8x128xf32, #tpu.memory_space<vmem>>) attributes {dimension_semantics = [#tpu.dimension_semantics<parallel>, #tpu.dimension_semantics<parallel>], iteration_bounds = array<i64: 2, 1>, scalar_prefetch = 0 : i64, scratch_operands = 0 : i64, tpu.core_type = #tpu.core_type<tc>, window_params = [{transform_indices = @transform_0, window_bounds = array<i64: 1, 2, 4, 8, 128>}, {transform_indices = @transform_1, window_bounds = array<i64: 1, 4, 8, 128>}, {transform_indices = @transform_2, window_bounds = array<i64: 1, 4, 8, 128>}, {transform_indices = @transform_3, window_bounds = array<i64: 1, 4, 8, 128>}, {transform_indices = @transform_4, window_bounds = array<i64: 1, 4, 8, 128>}]} {
    %c0 = arith.constant 0 : index
    %c1 = arith.constant 1 : index
    %c0_0 = arith.constant 0 : index
    %c0_1 = arith.constant 0 : index
    %c0_2 = arith.constant 0 : index
    %0 = vector.load %arg2[%c0, %c1, %c0_0, %c0_1, %c0_2] : memref<1x2x4x8x128xf32, #tpu.memory_space<vmem>>, vector<1x1x1x8x128xf32>
    %1 = vector.shape_cast %0 : vector<1x1x1x8x128xf32> to vector<8x128xf32>
    %c0_3 = arith.constant 0 : index
    %c1_4 = arith.constant 1 : index
    %c1_5 = arith.constant 1 : index
    %c0_6 = arith.constant 0 : index
    %c0_7 = arith.constant 0 : index
    %2 = vector.load %arg2[%c0_3, %c1_4, %c1_5, %c0_6, %c0_7] : memref<1x2x4x8x128xf32, #tpu.memory_space<vmem>>, vector<1x1x1x8x128xf32>
    %3 = vector.shape_cast %2 : vector<1x1x1x8x128xf32> to vector<8x128xf32>
    %4 = arith.maximumf %1, %3 : vector<8x128xf32>
    %c0_8 = arith.constant 0 : index
    %c1_9 = arith.constant 1 : index
    %c2 = arith.constant 2 : index
    %c0_10 = arith.constant 0 : index
    %c0_11 = arith.constant 0 : index
    %5 = vector.load %arg2[%c0_8, %c1_9, %c2, %c0_10, %c0_11] : memref<1x2x4x8x128xf32, #tpu.memory_space<vmem>>, vector<1x1x1x8x128xf32>
    %6 = vector.shape_cast %5 : vector<1x1x1x8x128xf32> to vector<8x128xf32>
    %7 = arith.maximumf %4, %6 : vector<8x128xf32>
    %c0_12 = arith.constant 0 : index
    %c1_13 = arith.constant 1 : index
    %c3 = arith.constant 3 : index
    %c0_14 = arith.constant 0 : index
    %c0_15 = arith.constant 0 : index
    %8 = vector.load %arg2[%c0_12, %c1_13, %c3, %c0_14, %c0_15] : memref<1x2x4x8x128xf32, #tpu.memory_space<vmem>>, vector<1x1x1x8x128xf32>
    %9 = vector.shape_cast %8 : vector<1x1x1x8x128xf32> to vector<8x128xf32>
    %10 = arith.maximumf %7, %9 : vector<8x128xf32>
    %cst = arith.constant 1.000000e-10 : f32
    %11 = vector.broadcast %cst : f32 to vector<8x128xf32>
    %12 = arith.maximumf %10, %11 : vector<8x128xf32>
    %cst_16 = arith.constant 1.000000e-10 : f32
    %13 = vector.broadcast %cst_16 : f32 to vector<8x128xf32>
    %14 = arith.subf %13, %12 : vector<8x128xf32>
    %cst_17 = arith.constant 1.000000e+04 : f32
    %15 = vector.broadcast %cst_17 : f32 to vector<8x128xf32>
    %16 = arith.mulf %14, %15 : vector<8x128xf32>
    %17 = math.exp %16 : vector<8x128xf32>
    %cst_18 = arith.constant 1.000000e-10 : f32
    %18 = vector.broadcast %cst_18 : f32 to vector<8x128xf32>
    %19 = arith.maximumf %17, %18 : vector<8x128xf32>
    %cst_19 = arith.constant 1.000000e+00 : f32
    %20 = vector.broadcast %cst_19 : f32 to vector<8x128xf32>
    %cst_20 = arith.constant 0.000000e+00 : f32
    %21 = vector.broadcast %cst_20 : f32 to vector<8x128xf32>
    %cst_21 = arith.constant 0.000000e+00 : f32
    %22 = vector.broadcast %cst_21 : f32 to vector<8x128xf32>
    %cst_22 = arith.constant 0.000000e+00 : f32
    %23 = vector.broadcast %cst_22 : f32 to vector<8x128xf32>
    %c0_23 = arith.constant 0 : index
    %c0_24 = arith.constant 0 : index
    %c0_25 = arith.constant 0 : index
    %c0_26 = arith.constant 0 : index
    %c0_27 = arith.constant 0 : index
    %24 = vector.load %arg2[%c0_23, %c0_24, %c0_25, %c0_26, %c0_27] : memref<1x2x4x8x128xf32, #tpu.memory_space<vmem>>, vector<1x1x1x8x128xf32>
    %25 = vector.shape_cast %24 : vector<1x1x1x8x128xf32> to vector<8x128xf32>
    %cst_28 = arith.constant 5.000000e-01 : f32
    %26 = vector.broadcast %cst_28 : f32 to vector<8x128xf32>
    %27 = arith.mulf %26, %25 : vector<8x128xf32>
    %28 = math.tanh %27 : vector<8x128xf32>
    %cst_29 = arith.constant 5.000000e-01 : f32
    %29 = vector.broadcast %cst_29 : f32 to vector<8x128xf32>
    %30 = arith.mulf %29, %28 : vector<8x128xf32>
    %cst_30 = arith.constant 5.000000e-01 : f32
    %31 = vector.broadcast %cst_30 : f32 to vector<8x128xf32>
    %32 = arith.addf %30, %31 : vector<8x128xf32>
    %cst_31 = arith.constant 1.000000e+00 : f32
    %33 = vector.broadcast %cst_31 : f32 to vector<8x128xf32>
    %34 = arith.subf %33, %32 : vector<8x128xf32>
    %35 = arith.mulf %20, %34 : vector<8x128xf32>
    %c0_32 = arith.constant 0 : index
    %c1_33 = arith.constant 1 : index
    %c0_34 = arith.constant 0 : index
    %c0_35 = arith.constant 0 : index
    %c0_36 = arith.constant 0 : index
    %36 = vector.load %arg2[%c0_32, %c1_33, %c0_34, %c0_35, %c0_36] : memref<1x2x4x8x128xf32, #tpu.memory_space<vmem>>, vector<1x1x1x8x128xf32>
    %37 = vector.shape_cast %36 : vector<1x1x1x8x128xf32> to vector<8x128xf32>
    %38 = arith.subf %37, %12 : vector<8x128xf32>
    %cst_37 = arith.constant 1.000000e+04 : f32
    %39 = vector.broadcast %cst_37 : f32 to vector<8x128xf32>
    %40 = arith.mulf %38, %39 : vector<8x128xf32>
    %41 = math.exp %40 : vector<8x128xf32>
    %42 = arith.mulf %32, %41 : vector<8x128xf32>
    %43 = arith.addf %19, %42 : vector<8x128xf32>
    %c0_38 = arith.constant 0 : index
    %c0_39 = arith.constant 0 : index
    %c0_40 = arith.constant 0 : index
    %c0_41 = arith.constant 0 : index
    %44 = vector.load %arg3[%c0_38, %c0_39, %c0_40, %c0_41] : memref<1x4x8x128xf32, #tpu.memory_space<vmem>>, vector<1x1x8x128xf32>
    %45 = vector.shape_cast %44 : vector<1x1x8x128xf32> to vector<8x128xf32>
    %46 = arith.mulf %42, %45 : vector<8x128xf32>
    %47 = arith.addf %21, %46 : vector<8x128xf32>
    %c0_42 = arith.constant 0 : index
    %c0_43 = arith.constant 0 : index
    %c0_44 = arith.constant 0 : index
    %c0_45 = arith.constant 0 : index
    %48 = vector.load %arg4[%c0_42, %c0_43, %c0_44, %c0_45] : memref<1x4x8x128xf32, #tpu.memory_space<vmem>>, vector<1x1x8x128xf32>
    %49 = vector.shape_cast %48 : vector<1x1x8x128xf32> to vector<8x128xf32>
    %50 = arith.mulf %42, %49 : vector<8x128xf32>
    %51 = arith.addf %22, %50 : vector<8x128xf32>
    %c0_46 = arith.constant 0 : index
    %c0_47 = arith.constant 0 : index
    %c0_48 = arith.constant 0 : index
    %c0_49 = arith.constant 0 : index
    %52 = vector.load %arg5[%c0_46, %c0_47, %c0_48, %c0_49] : memref<1x4x8x128xf32, #tpu.memory_space<vmem>>, vector<1x1x8x128xf32>
    %53 = vector.shape_cast %52 : vector<1x1x8x128xf32> to vector<8x128xf32>
    %54 = arith.mulf %42, %53 : vector<8x128xf32>
    %55 = arith.addf %23, %54 : vector<8x128xf32>
    %c0_50 = arith.constant 0 : index
    %c0_51 = arith.constant 0 : index
    %c1_52 = arith.constant 1 : index
    %c0_53 = arith.constant 0 : index
    %c0_54 = arith.constant 0 : index
    %56 = vector.load %arg2[%c0_50, %c0_51, %c1_52, %c0_53, %c0_54] : memref<1x2x4x8x128xf32, #tpu.memory_space<vmem>>, vector<1x1x1x8x128xf32>
    %57 = vector.shape_cast %56 : vector<1x1x1x8x128xf32> to vector<8x128xf32>
    %cst_55 = arith.constant 5.000000e-01 : f32
    %58 = vector.broadcast %cst_55 : f32 to vector<8x128xf32>
    %59 = arith.mulf %58, %57 : vector<8x128xf32>
    %60 = math.tanh %59 : vector<8x128xf32>
    %cst_56 = arith.constant 5.000000e-01 : f32
    %61 = vector.broadcast %cst_56 : f32 to vector<8x128xf32>
    %62 = arith.mulf %61, %60 : vector<8x128xf32>
    %cst_57 = arith.constant 5.000000e-01 : f32
    %63 = vector.broadcast %cst_57 : f32 to vector<8x128xf32>
    %64 = arith.addf %62, %63 : vector<8x128xf32>
    %cst_58 = arith.constant 1.000000e+00 : f32
    %65 = vector.broadcast %cst_58 : f32 to vector<8x128xf32>
    %66 = arith.subf %65, %64 : vector<8x128xf32>
    %67 = arith.mulf %35, %66 : vector<8x128xf32>
    %c0_59 = arith.constant 0 : index
    %c1_60 = arith.constant 1 : index
    %c1_61 = arith.constant 1 : index
    %c0_62 = arith.constant 0 : index
    %c0_63 = arith.constant 0 : index
    %68 = vector.load %arg2[%c0_59, %c1_60, %c1_61, %c0_62, %c0_63] : memref<1x2x4x8x128xf32, #tpu.memory_space<vmem>>, vector<1x1x1x8x128xf32>
    %69 = vector.shape_cast %68 : vector<1x1x1x8x128xf32> to vector<8x128xf32>
    %70 = arith.subf %69, %12 : vector<8x128xf32>
    %cst_64 = arith.constant 1.000000e+04 : f32
    %71 = vector.broadcast %cst_64 : f32 to vector<8x128xf32>
    %72 = arith.mulf %70, %71 : vector<8x128xf32>
    %73 = math.exp %72 : vector<8x128xf32>
    %74 = arith.mulf %64, %73 : vector<8x128xf32>
    %75 = arith.addf %43, %74 : vector<8x128xf32>
    %c0_65 = arith.constant 0 : index
    %c1_66 = arith.constant 1 : index
    %c0_67 = arith.constant 0 : index
    %c0_68 = arith.constant 0 : index
    %76 = vector.load %arg3[%c0_65, %c1_66, %c0_67, %c0_68] : memref<1x4x8x128xf32, #tpu.memory_space<vmem>>, vector<1x1x8x128xf32>
    %77 = vector.shape_cast %76 : vector<1x1x8x128xf32> to vector<8x128xf32>
    %78 = arith.mulf %74, %77 : vector<8x128xf32>
    %79 = arith.addf %47, %78 : vector<8x128xf32>
    %c0_69 = arith.constant 0 : index
    %c1_70 = arith.constant 1 : index
    %c0_71 = arith.constant 0 : index
    %c0_72 = arith.constant 0 : index
    %80 = vector.load %arg4[%c0_69, %c1_70, %c0_71, %c0_72] : memref<1x4x8x128xf32, #tpu.memory_space<vmem>>, vector<1x1x8x128xf32>
    %81 = vector.shape_cast %80 : vector<1x1x8x128xf32> to vector<8x128xf32>
    %82 = arith.mulf %74, %81 : vector<8x128xf32>
    %83 = arith.addf %51, %82 : vector<8x128xf32>
    %c0_73 = arith.constant 0 : index
    %c1_74 = arith.constant 1 : index
    %c0_75 = arith.constant 0 : index
    %c0_76 = arith.constant 0 : index
    %84 = vector.load %arg5[%c0_73, %c1_74, %c0_75, %c0_76] : memref<1x4x8x128xf32, #tpu.memory_space<vmem>>, vector<1x1x8x128xf32>
    %85 = vector.shape_cast %84 : vector<1x1x8x128xf32> to vector<8x128xf32>
    %86 = arith.mulf %74, %85 : vector<8x128xf32>
    %87 = arith.addf %55, %86 : vector<8x128xf32>
    %c0_77 = arith.constant 0 : index
    %c0_78 = arith.constant 0 : index
    %c2_79 = arith.constant 2 : index
    %c0_80 = arith.constant 0 : index
    %c0_81 = arith.constant 0 : index
    %88 = vector.load %arg2[%c0_77, %c0_78, %c2_79, %c0_80, %c0_81] : memref<1x2x4x8x128xf32, #tpu.memory_space<vmem>>, vector<1x1x1x8x128xf32>
    %89 = vector.shape_cast %88 : vector<1x1x1x8x128xf32> to vector<8x128xf32>
    %cst_82 = arith.constant 5.000000e-01 : f32
    %90 = vector.broadcast %cst_82 : f32 to vector<8x128xf32>
    %91 = arith.mulf %90, %89 : vector<8x128xf32>
    %92 = math.tanh %91 : vector<8x128xf32>
    %cst_83 = arith.constant 5.000000e-01 : f32
    %93 = vector.broadcast %cst_83 : f32 to vector<8x128xf32>
    %94 = arith.mulf %93, %92 : vector<8x128xf32>
    %cst_84 = arith.constant 5.000000e-01 : f32
    %95 = vector.broadcast %cst_84 : f32 to vector<8x128xf32>
    %96 = arith.addf %94, %95 : vector<8x128xf32>
    %cst_85 = arith.constant 1.000000e+00 : f32
    %97 = vector.broadcast %cst_85 : f32 to vector<8x128xf32>
    %98 = arith.subf %97, %96 : vector<8x128xf32>
    %99 = arith.mulf %67, %98 : vector<8x128xf32>
    %c0_86 = arith.constant 0 : index
    %c1_87 = arith.constant 1 : index
    %c2_88 = arith.constant 2 : index
    %c0_89 = arith.constant 0 : index
    %c0_90 = arith.constant 0 : index
    %100 = vector.load %arg2[%c0_86, %c1_87, %c2_88, %c0_89, %c0_90] : memref<1x2x4x8x128xf32, #tpu.memory_space<vmem>>, vector<1x1x1x8x128xf32>
    %101 = vector.shape_cast %100 : vector<1x1x1x8x128xf32> to vector<8x128xf32>
    %102 = arith.subf %101, %12 : vector<8x128xf32>
    %cst_91 = arith.constant 1.000000e+04 : f32
    %103 = vector.broadcast %cst_91 : f32 to vector<8x128xf32>
    %104 = arith.mulf %102, %103 : vector<8x128xf32>
    %105 = math.exp %104 : vector<8x128xf32>
    %106 = arith.mulf %96, %105 : vector<8x128xf32>
    %107 = arith.addf %75, %106 : vector<8x128xf32>
    %c0_92 = arith.constant 0 : index
    %c2_93 = arith.constant 2 : index
    %c0_94 = arith.constant 0 : index
    %c0_95 = arith.constant 0 : index
    %108 = vector.load %arg3[%c0_92, %c2_93, %c0_94, %c0_95] : memref<1x4x8x128xf32, #tpu.memory_space<vmem>>, vector<1x1x8x128xf32>
    %109 = vector.shape_cast %108 : vector<1x1x8x128xf32> to vector<8x128xf32>
    %110 = arith.mulf %106, %109 : vector<8x128xf32>
    %111 = arith.addf %79, %110 : vector<8x128xf32>
    %c0_96 = arith.constant 0 : index
    %c2_97 = arith.constant 2 : index
    %c0_98 = arith.constant 0 : index
    %c0_99 = arith.constant 0 : index
    %112 = vector.load %arg4[%c0_96, %c2_97, %c0_98, %c0_99] : memref<1x4x8x128xf32, #tpu.memory_space<vmem>>, vector<1x1x8x128xf32>
    %113 = vector.shape_cast %112 : vector<1x1x8x128xf32> to vector<8x128xf32>
    %114 = arith.mulf %106, %113 : vector<8x128xf32>
    %115 = arith.addf %83, %114 : vector<8x128xf32>
    %c0_100 = arith.constant 0 : index
    %c2_101 = arith.constant 2 : index
    %c0_102 = arith.constant 0 : index
    %c0_103 = arith.constant 0 : index
    %116 = vector.load %arg5[%c0_100, %c2_101, %c0_102, %c0_103] : memref<1x4x8x128xf32, #tpu.memory_space<vmem>>, vector<1x1x8x128xf32>
    %117 = vector.shape_cast %116 : vector<1x1x8x128xf32> to vector<8x128xf32>
    %118 = arith.mulf %106, %117 : vector<8x128xf32>
    %119 = arith.addf %87, %118 : vector<8x128xf32>
    %c0_104 = arith.constant 0 : index
    %c0_105 = arith.constant 0 : index
    %c3_106 = arith.constant 3 : index
    %c0_107 = arith.constant 0 : index
    %c0_108 = arith.constant 0 : index
    %120 = vector.load %arg2[%c0_104, %c0_105, %c3_106, %c0_107, %c0_108] : memref<1x2x4x8x128xf32, #tpu.memory_space<vmem>>, vector<1x1x1x8x128xf32>
    %121 = vector.shape_cast %120 : vector<1x1x1x8x128xf32> to vector<8x128xf32>
    %cst_109 = arith.constant 5.000000e-01 : f32
    %122 = vector.broadcast %cst_109 : f32 to vector<8x128xf32>
    %123 = arith.mulf %122, %121 : vector<8x128xf32>
    %124 = math.tanh %123 : vector<8x128xf32>
    %cst_110 = arith.constant 5.000000e-01 : f32
    %125 = vector.broadcast %cst_110 : f32 to vector<8x128xf32>
    %126 = arith.mulf %125, %124 : vector<8x128xf32>
    %cst_111 = arith.constant 5.000000e-01 : f32
    %127 = vector.broadcast %cst_111 : f32 to vector<8x128xf32>
    %128 = arith.addf %126, %127 : vector<8x128xf32>
    %cst_112 = arith.constant 1.000000e+00 : f32
    %129 = vector.broadcast %cst_112 : f32 to vector<8x128xf32>
    %130 = arith.subf %129, %128 : vector<8x128xf32>
    %131 = arith.mulf %99, %130 : vector<8x128xf32>
    %c0_113 = arith.constant 0 : index
    %c1_114 = arith.constant 1 : index
    %c3_115 = arith.constant 3 : index
    %c0_116 = arith.constant 0 : index
    %c0_117 = arith.constant 0 : index
    %132 = vector.load %arg2[%c0_113, %c1_114, %c3_115, %c0_116, %c0_117] : memref<1x2x4x8x128xf32, #tpu.memory_space<vmem>>, vector<1x1x1x8x128xf32>
    %133 = vector.shape_cast %132 : vector<1x1x1x8x128xf32> to vector<8x128xf32>
    %134 = arith.subf %133, %12 : vector<8x128xf32>
    %cst_118 = arith.constant 1.000000e+04 : f32
    %135 = vector.broadcast %cst_118 : f32 to vector<8x128xf32>
    %136 = arith.mulf %134, %135 : vector<8x128xf32>
    %137 = math.exp %136 : vector<8x128xf32>
    %138 = arith.mulf %128, %137 : vector<8x128xf32>
    %139 = arith.addf %107, %138 : vector<8x128xf32>
    %c0_119 = arith.constant 0 : index
    %c3_120 = arith.constant 3 : index
    %c0_121 = arith.constant 0 : index
    %c0_122 = arith.constant 0 : index
    %140 = vector.load %arg3[%c0_119, %c3_120, %c0_121, %c0_122] : memref<1x4x8x128xf32, #tpu.memory_space<vmem>>, vector<1x1x8x128xf32>
    %141 = vector.shape_cast %140 : vector<1x1x8x128xf32> to vector<8x128xf32>
    %142 = arith.mulf %138, %141 : vector<8x128xf32>
    %143 = arith.addf %111, %142 : vector<8x128xf32>
    %c0_123 = arith.constant 0 : index
    %c3_124 = arith.constant 3 : index
    %c0_125 = arith.constant 0 : index
    %c0_126 = arith.constant 0 : index
    %144 = vector.load %arg4[%c0_123, %c3_124, %c0_125, %c0_126] : memref<1x4x8x128xf32, #tpu.memory_space<vmem>>, vector<1x1x8x128xf32>
    %145 = vector.shape_cast %144 : vector<1x1x8x128xf32> to vector<8x128xf32>
    %146 = arith.mulf %138, %145 : vector<8x128xf32>
    %147 = arith.addf %115, %146 : vector<8x128xf32>
    %c0_127 = arith.constant 0 : index
    %c3_128 = arith.constant 3 : index
    %c0_129 = arith.constant 0 : index
    %c0_130 = arith.constant 0 : index
    %148 = vector.load %arg5[%c0_127, %c3_128, %c0_129, %c0_130] : memref<1x4x8x128xf32, #tpu.memory_space<vmem>>, vector<1x1x8x128xf32>
    %149 = vector.shape_cast %148 : vector<1x1x8x128xf32> to vector<8x128xf32>
    %150 = arith.mulf %138, %149 : vector<8x128xf32>
    %151 = arith.addf %119, %150 : vector<8x128xf32>
    %152 = tpu.reciprocal %139 {approx = true} : vector<8x128xf32> -> vector<8x128xf32>
    %153 = arith.mulf %139, %152 : vector<8x128xf32>
    %cst_131 = arith.constant 2.000000e+00 : f32
    %154 = vector.broadcast %cst_131 : f32 to vector<8x128xf32>
    %155 = arith.subf %154, %153 : vector<8x128xf32>
    %156 = arith.mulf %152, %155 : vector<8x128xf32>
    %157 = arith.mulf %139, %156 : vector<8x128xf32>
    %cst_132 = arith.constant 2.000000e+00 : f32
    %158 = vector.broadcast %cst_132 : f32 to vector<8x128xf32>
    %159 = arith.subf %158, %157 : vector<8x128xf32>
    %160 = arith.mulf %156, %159 : vector<8x128xf32>
    %161 = arith.mulf %19, %160 : vector<8x128xf32>
    %162 = arith.mulf %143, %160 : vector<8x128xf32>
    %cst_133 = arith.constant 1.000000e+00 : f32
    %163 = vector.broadcast %cst_133 : f32 to vector<8x128xf32>
    %164 = arith.mulf %161, %163 : vector<8x128xf32>
    %165 = arith.addf %162, %164 : vector<8x128xf32>
    %c0_134 = arith.constant 0 : index
    %c0_135 = arith.constant 0 : index
    %c0_136 = arith.constant 0 : index
    %c0_137 = arith.constant 0 : index
    %166 = vector.load %arg6[%c0_134, %c0_135, %c0_136, %c0_137] : memref<1x4x8x128xf32, #tpu.memory_space<vmem>>, vector<1x1x8x128xf32>
    %167 = vector.shape_cast %166 : vector<1x1x8x128xf32> to vector<8x128xf32>
    %168 = vector.shape_cast %165 : vector<8x128xf32> to vector<1x1x8x128xf32>
    tpu.vector_store %arg6[%c0_134, %c0_135, %c0_136, %c0_137], %168 {strides = array<i32>} : memref<1x4x8x128xf32, #tpu.memory_space<vmem>>, vector<1x1x8x128xf32>,
    %169 = arith.mulf %147, %160 : vector<8x128xf32>
    %cst_138 = arith.constant 1.000000e+00 : f32
    %170 = vector.broadcast %cst_138 : f32 to vector<8x128xf32>
    %171 = arith.mulf %161, %170 : vector<8x128xf32>
    %172 = arith.addf %169, %171 : vector<8x128xf32>
    %c0_139 = arith.constant 0 : index
    %c1_140 = arith.constant 1 : index
    %c0_141 = arith.constant 0 : index
    %c0_142 = arith.constant 0 : index
    %173 = vector.load %arg6[%c0_139, %c1_140, %c0_141, %c0_142] : memref<1x4x8x128xf32, #tpu.memory_space<vmem>>, vector<1x1x8x128xf32>
    %174 = vector.shape_cast %173 : vector<1x1x8x128xf32> to vector<8x128xf32>
    %175 = vector.shape_cast %172 : vector<8x128xf32> to vector<1x1x8x128xf32>
    tpu.vector_store %arg6[%c0_139, %c1_140, %c0_141, %c0_142], %175 {strides = array<i32>} : memref<1x4x8x128xf32, #tpu.memory_space<vmem>>, vector<1x1x8x128xf32>,
    %176 = arith.mulf %151, %160 : vector<8x128xf32>
    %cst_143 = arith.constant 1.000000e+00 : f32
    %177 = vector.broadcast %cst_143 : f32 to vector<8x128xf32>
    %178 = arith.mulf %161, %177 : vector<8x128xf32>
    %179 = arith.addf %176, %178 : vector<8x128xf32>
    %c0_144 = arith.constant 0 : index
    %c2_145 = arith.constant 2 : index
    %c0_146 = arith.constant 0 : index
    %c0_147 = arith.constant 0 : index
    %180 = vector.load %arg6[%c0_144, %c2_145, %c0_146, %c0_147] : memref<1x4x8x128xf32, #tpu.memory_space<vmem>>, vector<1x1x8x128xf32>
    %181 = vector.shape_cast %180 : vector<1x1x8x128xf32> to vector<8x128xf32>
    %182 = vector.shape_cast %179 : vector<8x128xf32> to vector<1x1x8x128xf32>
    tpu.vector_store %arg6[%c0_144, %c2_145, %c0_146, %c0_147], %182 {strides = array<i32>} : memref<1x4x8x128xf32, #tpu.memory_space<vmem>>, vector<1x1x8x128xf32>,
    %cst_148 = arith.constant 1.000000e+00 : f32
    %183 = vector.broadcast %cst_148 : f32 to vector<8x128xf32>
    %184 = arith.subf %183, %131 : vector<8x128xf32>
    %c0_149 = arith.constant 0 : index
    %c3_150 = arith.constant 3 : index
    %c0_151 = arith.constant 0 : index
    %c0_152 = arith.constant 0 : index
    %185 = vector.load %arg6[%c0_149, %c3_150, %c0_151, %c0_152] : memref<1x4x8x128xf32, #tpu.memory_space<vmem>>, vector<1x1x8x128xf32>
    %186 = vector.shape_cast %185 : vector<1x1x8x128xf32> to vector<8x128xf32>
    %187 = vector.shape_cast %184 : vector<8x128xf32> to vector<1x1x8x128xf32>
    tpu.vector_store %arg6[%c0_149, %c3_150, %c0_151, %c0_152], %187 {strides = array<i32>} : memref<1x4x8x128xf32, #tpu.memory_space<vmem>>, vector<1x1x8x128xf32>,
    return
  }
  func.func @transform_0(%arg0: i32, %arg1: i32) -> (i32, i32, i32, i32, i32) {
    %c0_i32 = arith.constant 0 : i32
    %c0_i32_0 = arith.constant 0 : i32
    %c0_i32_1 = arith.constant 0 : i32
    %c0_i32_2 = arith.constant 0 : i32
    return %arg0, %c0_i32, %c0_i32_0, %arg1, %c0_i32_1 : i32, i32, i32, i32, i32
  }
  func.func @transform_1(%arg0: i32, %arg1: i32) -> (i32, i32, i32, i32) {
    %c0_i32 = arith.constant 0 : i32
    %c0_i32_0 = arith.constant 0 : i32
    %c0_i32_1 = arith.constant 0 : i32
    return %arg0, %c0_i32, %arg1, %c0_i32_0 : i32, i32, i32, i32
  }
  func.func @transform_2(%arg0: i32, %arg1: i32) -> (i32, i32, i32, i32) {
    %c0_i32 = arith.constant 0 : i32
    %c0_i32_0 = arith.constant 0 : i32
    %c0_i32_1 = arith.constant 0 : i32
    return %arg0, %c0_i32, %arg1, %c0_i32_0 : i32, i32, i32, i32
  }
  func.func @transform_3(%arg0: i32, %arg1: i32) -> (i32, i32, i32, i32) {
    %c0_i32 = arith.constant 0 : i32
    %c0_i32_0 = arith.constant 0 : i32
    %c0_i32_1 = arith.constant 0 : i32
    return %arg0, %c0_i32, %arg1, %c0_i32_0 : i32, i32, i32, i32
  }
  func.func @transform_4(%arg0: i32, %arg1: i32) -> (i32, i32, i32, i32) {
    %c0_i32 = arith.constant 0 : i32
    %c0_i32_0 = arith.constant 0 : i32
    %c0_i32_1 = arith.constant 0 : i32
    return %arg0, %c0_i32, %arg1, %c0_i32_0 : i32, i32, i32, i32
  }
}

</mosaic_0001>

<bundles_post_ra>
// kernel: soft_gouraud_shader.1
= control target key start
LH: loop header
LB: loop body
LE: loop exit
PB: predicated region body
PF: predicated region fallthrough
CT: control target
= control target key end

     0   :  { %s731_s15 = smov 0   ;;  %s733_s16 = smov 0   ;;  %s786_s0 = inlined_call_operand.vmem [shape: f32[2,2,4,8,128], index: 0, kind: input, shape index: {}]   ;;  %s787_s1 = inlined_call_operand.vmem [shape: f32[2,4,8,128], index: 1, kind: input, shape index: {}]   ;;  %s788_s2 = inlined_call_operand.vmem [shape: f32[2,4,8,128], index: 2, kind: input, shape index: {}]   ;;  %s789_s3 = inlined_call_operand.vmem [shape: f32[2,4,8,128], index: 3, kind: input, shape index: {}]   ;;  %s790_s4 = inlined_call_operand.vmem [shape: f32[2,4,8,128], index: 4, kind: output, shape index: {}]  }
   0x1   :  { %s735_s17 = smov 0  }
   0x2 LB: > { %s26_s18 = sadd.s32 1, %s700_s16  ;;  %p601_p0 = scmp.ge.s32.totalorder %s704_s17, 1  ;;  %s704_s17 = sphi %s735_s17, %s14_s17   ;;  %s700_s16 = sphi %s733_s16, %s792_s16   ;;  %s696_s15 = sphi %s731_s15, %s791_s15  }
   0x3   : > { %p28_p1 = scmp.ge.s32.totalorder %s26_s18, 2  ;;  %p226_p2 = scmp.lt.s32.totalorder %s704_s17, 3 }
   0x5   : > { %s794_s18 = smov (%p28_p1, %s26_s18), 0  ;;  %p227_p3 = pnand %p601_p0, %p226_p2 }
   0x6   : > { %p282_p4 = scmp.lt.s32.totalorder (!%p227_p3), %s696_s15, 1 }
   0x7   : > { %230 = sbr.rel (%p227_p3) target bundleno = 83 (0x53), region = 36 }
   0xe   : > { %s796_s15 = smov (!%p282_p4, %s696_s15), 1 }
   0xf   : > { %s633_s19 = sshll.u32 %s796_s15, 6  ;;  %s634_s23 = sshll.u32 %s796_s15, 5 }
  0x10   : > { %s289_s22 = scalar_lea.vmem %s786_s0, %s633_s19  ;;  %s762_s26 = scalar_lea.vmem %s790_s4, %s634_s23 }
  0x11   : > { %v612_v0 = vld [vmem:[%s289_s22 + $0x20] sm:$0xff]  ;;  %v613_v1 = vld [vmem:[%s289_s22 + $0x28] sm:$0xff]  ;;  %v614_v2 = vld [vmem:[%s289_s22 + $0x30] sm:$0xff]  ;;  %s297_s29 = scalar_lea.vmem %s787_s1, %s634_s23  ;;  %s305_s6 = scalar_lea.vmem %s788_s2, %s634_s23 }
  0x12   : > { %v326_v3 = vmax.f32 %v612_v0, %v613_v1  ;;  %v339_v4 = vld [vmem:[%s289_s22] sm:$0xff]  ;;  %v615_v5 = vld [vmem:[%s289_s22 + $0x38] sm:$0xff]  ;;  %v616_v7 = vld [vmem:[%s289_s22 + $0x8] sm:$0xff]  ;;  %s313_s9 = scalar_lea.vmem %s789_s3, %s634_s23 }
  0x13   : > { %v340_v6 = vmul.f32 0.5, %v339_v4  ;;  %v620_v8 = vld [vmem:[%s289_s22 + $0x10] sm:$0xff]  ;;  %v362_v10 = vmul.f32 0.5, %v616_v7  ;;  %v624_v12 = vld [vmem:[%s289_s22 + $0x18] sm:$0xff]  ;;  %v618_v4 = vld [vmem:[%s305_s6 + $0x8] sm:$0xff] }
  0x14   : > { %v329_v9 = vmax.f32 %v326_v3, %v614_v2  ;;  %v388_v11 = vmul.f32 0.5, %v620_v8  ;;  %v414_v13 = vmul.f32 0.5, %v624_v12  ;;  %v354_v3 = vld [vmem:[%s305_s6] sm:$0xff]  ;;  %v622_v12 = vld [vmem:[%s305_s6 + $0x10] sm:$0xff] }
  0x15   : > { %662 = vtanh.f32 %v340_v6  ;;  %v619_v6 = vld [vmem:[%s313_s9 + $0x8] sm:$0xff] }
  0x16   : > { %v332_v14 = vmax.f32 %v329_v9, %v615_v5  ;;  %664 = vtanh.f32 %v362_v10  ;;  %v621_v9 = vld [vmem:[%s297_s29 + $0x10] sm:$0xff] }
  0x17   : > { %666 = vtanh.f32 %v388_v11 }
  0x18   : > { %v333_v15 = vmax.f32 %v332_v14, 1e-10  ;;  %668 = vtanh.f32 %v414_v13 }
  0x1a   : > { %v334_v16 = vsub.f32 1e-10, %v333_v15  ;;  %v345_v17 = vsub.f32 %v612_v0, %v333_v15  ;;  %v368_v18 = vsub.f32 %v613_v1, %v333_v15  ;;  %v394_v19 = vsub.f32 %v614_v2, %v333_v15  ;;  %v351_v1 = vld [vmem:[%s297_s29] sm:$0xff]  ;;  %v617_v2 = vld [vmem:[%s297_s29 + $0x8] sm:$0xff] }
  0x1b   : > { %v420_v20 = vsub.f32 %v615_v5, %v333_v15  ;;  %v357_v5 = vld [vmem:[%s313_s9] sm:$0xff]  ;;  %v623_v15 = vld [vmem:[%s313_s9 + $0x10] sm:$0xff] }
  0x1c   : > { %v335_v21 = vmul.f32 10000.0, %v334_v16  ;;  %v346_v22 = vmul.f32 10000.0, %v345_v17  ;;  %v369_v23 = vmul.f32 10000.0, %v368_v18  ;;  %v395_v24 = vmul.f32 10000.0, %v394_v19 }
  0x1d   : > { %v421_v25 = vmul.f32 10000.0, %v420_v20  ;;  %v625_v20 = vld [vmem:[%s297_s29 + $0x18] sm:$0xff] }
  0x1e   : > { %v336_v26 = vmul.f32 1.442695, %v335_v21  ;;  %v347_v27 = vmul.f32 1.442695, %v346_v22  ;;  %v370_v28 = vmul.f32 1.442695, %v369_v23 }
  0x1f   : > { %v663_v29 = vpop.eup %662  ;;  %v396_v30 = vmul.f32 1.442695, %v395_v24  ;;  %v422_v33 = vmul.f32 1.442695, %v421_v25  ;;  %v626_v23 = vld [vmem:[%s305_s6 + $0x18] sm:$0xff] }
  0x20   : > { %v665_v31 = vpop.eup %664  ;;  %670 = vpow2.f32 %v336_v26  ;;  %v342_v32 = vmul.f32 0.5, %v663_v29  ;;  %v627_v26 = vld [vmem:[%s313_s9 + $0x18] sm:$0xff] }
  0x21   : > { %v667_v34 = vpop.eup %666  ;;  %672 = vpow2.f32 %v347_v27  ;;  %v364_v35 = vmul.f32 0.5, %v665_v31 }
  0x22   : > { %v669_v36 = vpop.eup %668  ;;  %v343_v37 = vadd.f32 0.5, %v342_v32  ;;  %674 = vpow2.f32 %v370_v28  ;;  %v390_v38 = vmul.f32 0.5, %v667_v34 }
  0x23   : > { %v365_v39 = vadd.f32 0.5, %v364_v35  ;;  %676 = vpow2.f32 %v396_v30  ;;  %v416_v40 = vmul.f32 0.5, %v669_v36 }
  0x24   : > { %v391_v41 = vadd.f32 0.5, %v390_v38  ;;  %678 = vpow2.f32 %v422_v33  ;;  %v344_v42 = vsub.f32 1.0, %v343_v37 }
  0x25   : > { %v417_v43 = vadd.f32 0.5, %v416_v40  ;;  %v366_v44 = vsub.f32 1.0, %v365_v39 }
  0x26   : > { %v392_v45 = vsub.f32 1.0, %v391_v41 }
  0x27   : > { %v367_v46 = vmul.f32 %v366_v44, %v344_v42  ;;  %v418_v47 = vsub.f32 1.0, %v417_v43 }
  0x29   : > { %v393_v48 = vmul.f32 %v392_v45, %v367_v46 }
  0x2a   : > { %v755_v49 = vpop.eup %670 }
  0x2b   : > { %v673_v50 = vpop.eup %672  ;;  %v338_v51 = vmax.f32 %v755_v49, 1e-10  ;;  %v419_v52 = vmul.f32 %v418_v47, %v393_v48 }
  0x2c   : > { %v675_v53 = vpop.eup %674  ;;  %v349_v54 = vmul.f32 %v673_v50, %v343_v37 }
  0x2d   : > { %v677_v55 = vpop.eup %676  ;;  %v372_v56 = vmul.f32 %v675_v53, %v365_v39  ;;  %v457_v57 = vsub.f32 1.0, %v419_v52 }
  0x2e   : > { %v679_v58 = vpop.eup %678  ;;  %v350_v59 = vadd.f32 %v349_v54, %v338_v51  ;;  %v398_v60 = vmul.f32 %v677_v55, %v391_v41  ;;  %v352_v7 = vmul.f32 %v351_v1, %v349_v54  ;;  %v355_v10 = vmul.f32 %v354_v3, %v349_v54 }
  0x2f   : > { %630 = vst [vmem:[%s762_s26 + $0x18] sm:$0xff] %v457_v57  ;;  %v424_v62 = vmul.f32 %v679_v58, %v417_v43  ;;  %v376_v8 = vmul.f32 %v617_v2, %v372_v56  ;;  %v380_v11 = vmul.f32 %v618_v4, %v372_v56  ;;  %v358_v13 = vmul.f32 %v357_v5, %v349_v54 }
  0x30   : > { %v373_v61 = vadd.f32 %v372_v56, %v350_v59  ;;  %v384_v14 = vmul.f32 %v619_v6, %v372_v56  ;;  %v402_v18 = vmul.f32 %v621_v9, %v398_v60  ;;  %v406_v19 = vmul.f32 %v622_v12, %v398_v60 }
  0x31   : > { %v377_v17 = vadd.f32 %v376_v8, %v352_v7  ;;  %v381_v22 = vadd.f32 %v380_v11, %v355_v10  ;;  %v410_v25 = vmul.f32 %v623_v15, %v398_v60  ;;  %v428_v28 = vmul.f32 %v625_v20, %v424_v62 }
  0x32   : > { %v399_v63 = vadd.f32 %v398_v60, %v373_v61  ;;  %v385_v24 = vadd.f32 %v384_v14, %v358_v13  ;;  %v432_v29 = vmul.f32 %v626_v23, %v424_v62  ;;  %v436_v30 = vmul.f32 %v627_v26, %v424_v62 }
  0x33   : > { %v403_v31 = vadd.f32 %v402_v18, %v377_v17  ;;  %v407_v33 = vadd.f32 %v406_v19, %v381_v22 }
  0x34   : > { %v425_v0 = vadd.f32 %v424_v62, %v399_v63  ;;  %v411_v34 = vadd.f32 %v410_v25, %v385_v24 }
  0x35   : > { %v429_v36 = vadd.f32 %v428_v28, %v403_v31  ;;  %v433_v38 = vadd.f32 %v432_v29, %v407_v33 }
  0x36   : > { %680 = vrcp.f32 %v425_v0  ;;  %v437_v39 = vadd.f32 %v436_v30, %v411_v34 }
  0x40   : > { %v681_v16 = vpop.eup %680 }
  0x41   : > { %v439_v21 = vmul.f32 %v681_v16, %v425_v0 }
  0x43   : > { %v440_v27 = vsub.f32 2.0, %v439_v21 }
  0x45   : > { %v441_v32 = vmul.f32 %v681_v16, %v440_v27 }
  0x47   : > { %v442_v35 = vmul.f32 %v441_v32, %v425_v0 }
  0x49   : > { %v443_v37 = vsub.f32 2.0, %v442_v35 }
  0x4b   : > { %v444_v40 = vmul.f32 %v443_v37, %v441_v32 }
  0x4d   : > { %v445_v41 = vmul.f32 %v444_v40, %v338_v51  ;;  %v446_v42 = vmul.f32 %v444_v40, %v429_v36  ;;  %v449_v43 = vmul.f32 %v444_v40, %v433_v38  ;;  %v453_v44 = vmul.f32 %v444_v40, %v437_v39 }
  0x4f   : > { %v447_v45 = vadd.f32 %v446_v42, %v445_v41  ;;  %v450_v46 = vadd.f32 %v449_v43, %v445_v41  ;;  %v454_v47 = vadd.f32 %v453_v44, %v445_v41 }
  0x51   : > { %448 = vst [vmem:[%s762_s26] sm:$0xff] %v447_v45  ;;  %628 = vst [vmem:[%s762_s26 + $0x8] sm:$0xff] %v450_v46 }
  0x52   : > { %629 = vst [vmem:[%s762_s26 + $0x10] sm:$0xff] %v454_v47 }
  0x53 PF: > { %s14_s17 = sadd.s32 1, %s704_s17   ;;  %s791_s15 = smov %s700_s16 }
  0x54   : > { %p11_p5 = scmp.ge.s32.totalorder %s14_s17, 4   ;;  %s792_s16 = smov %s794_s18 }
  0x56   :  { %13 = sbr.rel (!%p11_p5) target bundleno = 2 (0x2), region = 94 }

</bundles_post_ra>
